<compile_context>
chip_gen: v7x
topology: tpu7x:2x2x1
jax: 0.10.0
libtpu: 0.0.40
codegen_flags: <defaults>
</compile_context>

<pallas_src>
import functools

import jax
import jax.numpy as jnp
from jax.experimental import pallas as pl
from jax.experimental.pallas import tpu as pltpu

N_FEATURES = 7
N_OUTPUTS = 4
HIDDEN_NODES = 64    # matches the PyTorch module's default
HIDDEN_LAYERS = 3    # matches the PyTorch module's default

LANE = 128           # TPU lane width; batch-tile granularity
IN_PAD = 8           # 7 input features  -> 8 (equals full array dim: legal block)
OUT_PAD = 8          # 4 output features -> 8


def _mlp_kernel(x_ref, w0_ref, b0_ref, w1_ref, b1_ref, w2_ref, b2_ref,
                w3_ref, b3_ref, o_ref):
    """Whole MLP forward for one (bt, 8) activation tile, fused in VMEM.

    Weight dtype (f32 or bf16) selects the MXU operand precision; accumulation
    is always f32 and biases are added in f32 after accumulation.
    """
    cdt = w0_ref.dtype
    h = x_ref[...].astype(cdt)

    h = jnp.dot(h, w0_ref[...], preferred_element_type=jnp.float32)
    h = jnp.maximum(h + b0_ref[...], 0.0).astype(cdt)

    h = jnp.dot(h, w1_ref[...], preferred_element_type=jnp.float32)
    h = jnp.maximum(h + b1_ref[...], 0.0).astype(cdt)

    h = jnp.dot(h, w2_ref[...], preferred_element_type=jnp.float32)
    h = jnp.maximum(h + b2_ref[...], 0.0).astype(cdt)

    out = jnp.dot(h, w3_ref[...], preferred_element_type=jnp.float32)
    o_ref[...] = (out + b3_ref[...]).astype(o_ref.dtype)


def _round_up(n, m):
    return ((n + m - 1) // m) * m


def _pad2(a, rows, cols):
    r, c = a.shape
    return jnp.pad(a, ((0, rows - r), (0, cols - c)))


def prepare_params(params, compute_dtype=jnp.bfloat16):
    """Pad + cast the weights once, OUTSIDE the jitted forward.

    params: list of 4 (W, b) pairs, W in (in, out) layout, b shaped (1, out).
    Returns flat tuple (w0, b0, ..., w3, b3):
      w0: (8, H), w1/w2: (H, H), w3: (H, 8)  in `compute_dtype`
      b0/b1/b2: (1, H), b3: (1, 8)           in float32
    Zero padding keeps padded input/output lanes exactly zero.
    """
    assert len(params) == HIDDEN_LAYERS + 1
    hidden = params[0][0].shape[1]
    in_dims = [IN_PAD] + [hidden] * HIDDEN_LAYERS
    out_dims = [hidden] * HIDDEN_LAYERS + [OUT_PAD]
    flat = []
    for (w, b), di, do in zip(params, in_dims, out_dims):
        flat.append(_pad2(jnp.asarray(w, jnp.float32), di, do).astype(compute_dtype))
        flat.append(_pad2(jnp.asarray(b, jnp.float32), 1, do))   # biases stay f32
    return tuple(flat)


@functools.partial(jax.jit, static_argnames=("batch_tile",))
def migration_predictor_forward(x, padded_params, *, batch_tile=2048):
    """x: (B, 7) float32; padded_params: output of prepare_params. -> (B, 4) f32."""
    w0, b0, w1, b1, w2, b2, w3, b3 = padded_params
    hidden = w0.shape[1]
    B = x.shape[0]

    # Batch tile: multiple of 128, <= batch_tile, and capped at ~ceil(B/2) so
    # large batches always yield >= 2 grid steps (v7x: work for both TCs).
    bt_cap = _round_up(-(-B // 2), LANE)
    bt = min(_round_up(batch_tile, LANE), bt_cap)
    B_pad = _round_up(B, bt)
    grid = B_pad // bt

    # Pad batch rows and features 7 -> 8 (NOT 128: keeps input DMA 16x smaller).
    x_p = jnp.pad(x.astype(jnp.float32),
                  ((0, B_pad - B), (0, IN_PAD - N_FEATURES)))

    # Constant index maps keep the tiny weights resident in VMEM while the
    # activation tiles stream through the standard double-buffered pipeline.
    const = lambda i: (0, 0)
    in_specs = [
        pl.BlockSpec((bt, IN_PAD), lambda i: (i, 0)),
        pl.BlockSpec((IN_PAD, hidden), const), pl.BlockSpec((1, hidden), const),
        pl.BlockSpec((hidden, hidden), const), pl.BlockSpec((1, hidden), const),
        pl.BlockSpec((hidden, hidden), const), pl.BlockSpec((1, hidden), const),
        pl.BlockSpec((hidden, OUT_PAD), const), pl.BlockSpec((1, OUT_PAD), const),
    ]

    out_padded = pl.pallas_call(
        _mlp_kernel,
        out_shape=jax.ShapeDtypeStruct((B_pad, OUT_PAD), jnp.float32),
        grid_spec=pltpu.PrefetchScalarGridSpec(
            num_scalar_prefetch=0,
            grid=(grid,),
            in_specs=in_specs,
            out_specs=pl.BlockSpec((bt, OUT_PAD), lambda i: (i, 0)),
        ),
        compiler_params=pltpu.CompilerParams(
            dimension_semantics=("parallel",)),
    )(x_p, w0, b0, w1, b1, w2, b2, w3, b3)

    # Slice back to the real batch and the 4 real output columns.
    return out_padded[:B, :N_OUTPUTS]


def init_params(key, hidden_nodes=HIDDEN_NODES, hidden_layers=HIDDEN_LAYERS):
    """Deterministic init mimicking torch.nn.Linear default (uniform +-1/sqrt(fan_in))."""
    dims = [N_FEATURES] + [hidden_nodes] * hidden_layers + [N_OUTPUTS]
    params = []
    for fan_in, fan_out in zip(dims[:-1], dims[1:]):
        key, kw, kb = jax.random.split(key, 3)
        bound = 1.0 / jnp.sqrt(jnp.float32(fan_in))
        # Stored as (in, out) so the kernel does x @ W.
        w = jax.random.uniform(kw, (fan_in, fan_out), jnp.float32, -bound, bound)
        b = jax.random.uniform(kb, (1, fan_out), jnp.float32, -bound, bound)
        params.append((w, b))
    return params


def reference_forward(x, params):
    h = x
    for i, (w, b) in enumerate(params):
        h = h @ w + b
        if i < len(params) - 1:
            h = jnp.maximum(h, 0.0)
    return h


if __name__ == "__main__":
    key = jax.random.PRNGKey(0)
    k_x, k_p = jax.random.split(key)

    params = init_params(k_p)
    params_bf16 = prepare_params(params, jnp.bfloat16)   # v6e/v7x-friendly operands
    params_f32 = prepare_params(params, jnp.float32)     # bit-tight validation path

    batch = 16  # deliberately NOT a multiple of the tile; padding handles it
    x = jax.random.normal(k_x, (batch, N_FEATURES), jnp.float32)
    ref = reference_forward(x, params)

    out_bf16 = jax.block_until_ready(migration_predictor_forward(x, params_bf16))
    assert out_bf16.shape == (batch, N_OUTPUTS)
    assert jnp.allclose(out_bf16, ref, atol=5e-2, rtol=5e-2), "mismatch (bf16)"

    out_f32 = jax.block_until_ready(migration_predictor_forward(x, params_f32))
    assert out_f32.shape == (batch, N_OUTPUTS)
    assert jnp.allclose(out_f32, ref, atol=1e-5, rtol=1e-5), "mismatch (f32)"

    # Batch that is not a multiple of 128 and spans > 1 grid step (grid >= 2).
    big_b = 300
    xb = jax.random.normal(k_x, (big_b, N_FEATURES), jnp.float32)
    refb = reference_forward(xb, params)
    outb = jax.block_until_ready(migration_predictor_forward(xb, params_f32))
    assert outb.shape == (big_b, N_OUTPUTS)
    assert jnp.allclose(outb, refb, atol=1e-5, rtol=1e-5), "mismatch (big batch)"

    print("KERNEL_OK")
</pallas_src>

<mosaic_0001>
module attributes {stable_mosaic.version = 11 : i64} {
  func.func @_mlp_kernel(%arg0: i32, %arg1: memref<128x8xf32, #tpu.memory_space<vmem>>, %arg2: memref<8x64xbf16, #tpu.memory_space<vmem>>, %arg3: memref<1x64xf32, #tpu.memory_space<vmem>>, %arg4: memref<64x64xbf16, #tpu.memory_space<vmem>>, %arg5: memref<1x64xf32, #tpu.memory_space<vmem>>, %arg6: memref<64x64xbf16, #tpu.memory_space<vmem>>, %arg7: memref<1x64xf32, #tpu.memory_space<vmem>>, %arg8: memref<64x8xbf16, #tpu.memory_space<vmem>>, %arg9: memref<1x8xf32, #tpu.memory_space<vmem>>, %arg10: memref<128x8xf32, #tpu.memory_space<vmem>>) attributes {dimension_semantics = [#tpu.dimension_semantics<parallel>], iteration_bounds = array<i64: 1>, scalar_prefetch = 0 : i64, scratch_operands = 0 : i64, tpu.core_type = #tpu.core_type<tc>, window_params = [{transform_indices = @transform_0, window_bounds = array<i64: 128, 8>}, {pipeline_mode = #tpu.pipeline_mode<synchronous>, transform_indices = @transform_1, window_bounds = array<i64: 8, 64>}, {pipeline_mode = #tpu.pipeline_mode<synchronous>, transform_indices = @transform_2, window_bounds = array<i64: 1, 64>}, {pipeline_mode = #tpu.pipeline_mode<synchronous>, transform_indices = @transform_3, window_bounds = array<i64: 64, 64>}, {pipeline_mode = #tpu.pipeline_mode<synchronous>, transform_indices = @transform_4, window_bounds = array<i64: 1, 64>}, {pipeline_mode = #tpu.pipeline_mode<synchronous>, transform_indices = @transform_5, window_bounds = array<i64: 64, 64>}, {pipeline_mode = #tpu.pipeline_mode<synchronous>, transform_indices = @transform_6, window_bounds = array<i64: 1, 64>}, {pipeline_mode = #tpu.pipeline_mode<synchronous>, transform_indices = @transform_7, window_bounds = array<i64: 64, 8>}, {pipeline_mode = #tpu.pipeline_mode<synchronous>, transform_indices = @transform_8, window_bounds = array<i64: 1, 8>}, {transform_indices = @transform_9, window_bounds = array<i64: 128, 8>}]} {
    %c0 = arith.constant 0 : index
    %c0_0 = arith.constant 0 : index
    %0 = vector.load %arg1[%c0, %c0_0] : memref<128x8xf32, #tpu.memory_space<vmem>>, vector<128x8xf32>
    %1 = arith.truncf %0 : vector<128x8xf32> to vector<128x8xbf16>
    %c0_1 = arith.constant 0 : index
    %c0_2 = arith.constant 0 : index
    %2 = vector.load %arg2[%c0_1, %c0_2] : memref<8x64xbf16, #tpu.memory_space<vmem>>, vector<8x64xbf16>
    %cst = arith.constant dense<0.000000e+00> : vector<128x64xf32>
    %3 = tpu.matmul %1, %2, %cst {dimension_numbers = #tpu.dot_dimension_numbers<[1], [0], [0], [1], [0, 0, 1, 1], [], []>} : vector<128x8xbf16>, vector<8x64xbf16>, vector<128x64xf32> -> vector<128x64xf32>
    %c0_3 = arith.constant 0 : index
    %c0_4 = arith.constant 0 : index
    %4 = vector.load %arg3[%c0_3, %c0_4] : memref<1x64xf32, #tpu.memory_space<vmem>>, vector<1x64xf32>
    %5 = vector.broadcast %4 : vector<1x64xf32> to vector<128x64xf32>
    %6 = arith.addf %3, %5 : vector<128x64xf32>
    %cst_5 = arith.constant 0.000000e+00 : f32
    %7 = vector.broadcast %cst_5 : f32 to vector<128x64xf32>
    %8 = arith.maximumf %6, %7 : vector<128x64xf32>
    %9 = arith.truncf %8 : vector<128x64xf32> to vector<128x64xbf16>
    %c0_6 = arith.constant 0 : index
    %c0_7 = arith.constant 0 : index
    %10 = vector.load %arg4[%c0_6, %c0_7] : memref<64x64xbf16, #tpu.memory_space<vmem>>, vector<64x64xbf16>
    %cst_8 = arith.constant dense<0.000000e+00> : vector<128x64xf32>
    %11 = tpu.matmul %9, %10, %cst_8 {dimension_numbers = #tpu.dot_dimension_numbers<[1], [0], [0], [1], [0, 0, 1, 1], [], []>} : vector<128x64xbf16>, vector<64x64xbf16>, vector<128x64xf32> -> vector<128x64xf32>
    %c0_9 = arith.constant 0 : index
    %c0_10 = arith.constant 0 : index
    %12 = vector.load %arg5[%c0_9, %c0_10] : memref<1x64xf32, #tpu.memory_space<vmem>>, vector<1x64xf32>
    %13 = vector.broadcast %12 : vector<1x64xf32> to vector<128x64xf32>
    %14 = arith.addf %11, %13 : vector<128x64xf32>
    %cst_11 = arith.constant 0.000000e+00 : f32
    %15 = vector.broadcast %cst_11 : f32 to vector<128x64xf32>
    %16 = arith.maximumf %14, %15 : vector<128x64xf32>
    %17 = arith.truncf %16 : vector<128x64xf32> to vector<128x64xbf16>
    %c0_12 = arith.constant 0 : index
    %c0_13 = arith.constant 0 : index
    %18 = vector.load %arg6[%c0_12, %c0_13] : memref<64x64xbf16, #tpu.memory_space<vmem>>, vector<64x64xbf16>
    %cst_14 = arith.constant dense<0.000000e+00> : vector<128x64xf32>
    %19 = tpu.matmul %17, %18, %cst_14 {dimension_numbers = #tpu.dot_dimension_numbers<[1], [0], [0], [1], [0, 0, 1, 1], [], []>} : vector<128x64xbf16>, vector<64x64xbf16>, vector<128x64xf32> -> vector<128x64xf32>
    %c0_15 = arith.constant 0 : index
    %c0_16 = arith.constant 0 : index
    %20 = vector.load %arg7[%c0_15, %c0_16] : memref<1x64xf32, #tpu.memory_space<vmem>>, vector<1x64xf32>
    %21 = vector.broadcast %20 : vector<1x64xf32> to vector<128x64xf32>
    %22 = arith.addf %19, %21 : vector<128x64xf32>
    %cst_17 = arith.constant 0.000000e+00 : f32
    %23 = vector.broadcast %cst_17 : f32 to vector<128x64xf32>
    %24 = arith.maximumf %22, %23 : vector<128x64xf32>
    %25 = arith.truncf %24 : vector<128x64xf32> to vector<128x64xbf16>
    %c0_18 = arith.constant 0 : index
    %c0_19 = arith.constant 0 : index
    %26 = vector.load %arg8[%c0_18, %c0_19] : memref<64x8xbf16, #tpu.memory_space<vmem>>, vector<64x8xbf16>
    %cst_20 = arith.constant dense<0.000000e+00> : vector<128x8xf32>
    %27 = tpu.matmul %25, %26, %cst_20 {dimension_numbers = #tpu.dot_dimension_numbers<[1], [0], [0], [1], [0, 0, 1, 1], [], []>} : vector<128x64xbf16>, vector<64x8xbf16>, vector<128x8xf32> -> vector<128x8xf32>
    %c0_21 = arith.constant 0 : index
    %c0_22 = arith.constant 0 : index
    %28 = vector.load %arg9[%c0_21, %c0_22] : memref<1x8xf32, #tpu.memory_space<vmem>>, vector<1x8xf32>
    %29 = vector.broadcast %28 : vector<1x8xf32> to vector<128x8xf32>
    %30 = arith.addf %27, %29 : vector<128x8xf32>
    %c0_23 = arith.constant 0 : index
    %c0_24 = arith.constant 0 : index
    %31 = vector.load %arg10[%c0_23, %c0_24] : memref<128x8xf32, #tpu.memory_space<vmem>>, vector<128x8xf32>
    tpu.vector_store %arg10[%c0_23, %c0_24], %30 {strides = array<i32>} : memref<128x8xf32, #tpu.memory_space<vmem>>, vector<128x8xf32>,
    return
  }
  func.func @transform_0(%arg0: i32) -> (i32, i32) {
    %c0_i32 = arith.constant 0 : i32
    %c0_i32_0 = arith.constant 0 : i32
    return %arg0, %c0_i32 : i32, i32
  }
  func.func @transform_1(%arg0: i32) -> (i32, i32) {
    %c0_i32 = arith.constant 0 : i32
    %c0_i32_0 = arith.constant 0 : i32
    %c0_i32_1 = arith.constant 0 : i32
    return %c0_i32, %c0_i32_0 : i32, i32
  }
  func.func @transform_2(%arg0: i32) -> (i32, i32) {
    %c0_i32 = arith.constant 0 : i32
    %c0_i32_0 = arith.constant 0 : i32
    %c0_i32_1 = arith.constant 0 : i32
    return %c0_i32, %c0_i32_0 : i32, i32
  }
  func.func @transform_3(%arg0: i32) -> (i32, i32) {
    %c0_i32 = arith.constant 0 : i32
    %c0_i32_0 = arith.constant 0 : i32
    %c0_i32_1 = arith.constant 0 : i32
    return %c0_i32, %c0_i32_0 : i32, i32
  }
  func.func @transform_4(%arg0: i32) -> (i32, i32) {
    %c0_i32 = arith.constant 0 : i32
    %c0_i32_0 = arith.constant 0 : i32
    %c0_i32_1 = arith.constant 0 : i32
    return %c0_i32, %c0_i32_0 : i32, i32
  }
  func.func @transform_5(%arg0: i32) -> (i32, i32) {
    %c0_i32 = arith.constant 0 : i32
    %c0_i32_0 = arith.constant 0 : i32
    %c0_i32_1 = arith.constant 0 : i32
    return %c0_i32, %c0_i32_0 : i32, i32
  }
  func.func @transform_6(%arg0: i32) -> (i32, i32) {
    %c0_i32 = arith.constant 0 : i32
    %c0_i32_0 = arith.constant 0 : i32
    %c0_i32_1 = arith.constant 0 : i32
    return %c0_i32, %c0_i32_0 : i32, i32
  }
  func.func @transform_7(%arg0: i32) -> (i32, i32) {
    %c0_i32 = arith.constant 0 : i32
    %c0_i32_0 = arith.constant 0 : i32
    %c0_i32_1 = arith.constant 0 : i32
    return %c0_i32, %c0_i32_0 : i32, i32
  }
  func.func @transform_8(%arg0: i32) -> (i32, i32) {
    %c0_i32 = arith.constant 0 : i32
    %c0_i32_0 = arith.constant 0 : i32
    %c0_i32_1 = arith.constant 0 : i32
    return %c0_i32, %c0_i32_0 : i32, i32
  }
  func.func @transform_9(%arg0: i32) -> (i32, i32) {
    %c0_i32 = arith.constant 0 : i32
    %c0_i32_0 = arith.constant 0 : i32
    return %arg0, %c0_i32 : i32, i32
  }
}

</mosaic_0001>

<bundles_post_ra>
// kernel: migration_predictor_forward.1
= control target key start
LH: loop header
LB: loop body
LE: loop exit
PB: predicated region body
PF: predicated region fallthrough
CT: control target
= control target key end

     0   :  { %vm90_vm0 = vcmask 1043456   ;;  %vm65_vm1 = vcmask 64512   ;;  %vm254_vm2 = vcmask 523264   ;;  %s1205_s1 = inlined_call_operand.vmem [shape: bf16[8,64], index: 1, kind: input, shape index: {}]   ;;  %s1206_s0 = inlined_call_operand.vmem [shape: f32[128,8], index: 0, kind: input, shape index: {}]   ;;  %s1207_s3 = inlined_call_operand.vmem [shape: bf16[64,64], index: 3, kind: input, shape index: {}]   ;;  %s1208_s5 = inlined_call_operand.vmem [shape: bf16[64,64], index: 5, kind: input, shape index: {}]   ;;  %s1209_s2 = inlined_call_operand.vmem [shape: f32[1,64], index: 2, kind: input, shape index: {}]   ;;  %s1210_s7 = inlined_call_operand.vmem [shape: bf16[64,8], index: 7, kind: input, shape index: {}]   ;;  %s1211_s4 = inlined_call_operand.vmem [shape: f32[1,64], index: 4, kind: input, shape index: {}]   ;;  %s1212_s6 = inlined_call_operand.vmem [shape: f32[1,64], index: 6, kind: input, shape index: {}]   ;;  %s1213_s8 = inlined_call_operand.vmem [shape: f32[1,8], index: 8, kind: input, shape index: {}]   ;;  %s1214_s9 = inlined_call_operand.vmem [shape: f32[128,8], index: 9, kind: output, shape index: {}]  }
   0x1   :  { %v57_v0 = vld [vmem:[%s1205_s1] sm:$0xf]  ;;  %v34_v2 = vld [vmem:[%s1206_s0 + $0x8] sm:$0xff]  ;;  %v35_v5 = vld [vmem:[%s1206_s0 + $0x10] sm:$0xff] }
   0x2   :  { %v33_v1 = vld [vmem:[%s1206_s0] sm:$0xff]  ;;  %947 = vmatprep.subr.msk.bf16.mxu0 %vm90_vm0, %v57_v0  ;;  %v92_v3 = vsel %vm90_vm0, %v57_v0, 0  ;;  %v36_v6 = vld [vmem:[%s1206_s0 + $0x18] sm:$0xff]  ;;  %v38_v9 = vld [vmem:[%s1206_s0 + $0x28] sm:$0xff] }
   0x3   :  { %v49_v4 = vpack.c.bf16 %v34_v2, %v33_v1  ;;  %v37_v7 = vld [vmem:[%s1206_s0 + $0x20] sm:$0xff]  ;;  %858 = vmatpush3.bf16.msra.mxu0 %v92_v3  ;;  %v50_v8 = vpack.c.bf16 %v36_v6, %v35_v5  ;;  %v39_v11 = vld [vmem:[%s1206_s0 + $0x30] sm:$0xff]  ;;  %v40_v12 = vld [vmem:[%s1206_s0 + $0x38] sm:$0xff] }
   0x4   :  { %v51_v10 = vpack.c.bf16 %v38_v9, %v37_v7  ;;  %v41_v13 = vld [vmem:[%s1206_s0 + $0x40] sm:$0xff]  ;;  %v42_v14 = vld [vmem:[%s1206_s0 + $0x48] sm:$0xff]  ;;  %v52_v17 = vpack.c.bf16 %v40_v12, %v39_v11  ;;  %v43_v19 = vld [vmem:[%s1206_s0 + $0x50] sm:$0xff] }
   0x5   :  { %859 = vmatprep.mubr.msk.bf16.mxu0 %vm65_vm1, %v49_v4  ;;  %v948_v15 = vld [vmem:[%s1207_s3] sm:$0xff]   ;;  %v949_v16 = vld [vmem:[%s1207_s3 + $0x8] sm:$0xff]   ;;  %v53_v18 = vpack.c.bf16 %v42_v14, %v41_v13  ;;  %v44_v20 = vld [vmem:[%s1206_s0 + $0x58] sm:$0xff] }
   0x6   :  { %860 = vmatmul.mubr.msk.bf16.vlgmr.msra.gmra.mrb[0].mxu0 %vm65_vm1, %v50_v8  ;;  %875 = vmatprep.subr.bf16.mxu1 %v948_v15  ;;  %v45_v21 = vld [vmem:[%s1206_s0 + $0x60] sm:$0xff]  ;;  %v46_v22 = vld [vmem:[%s1206_s0 + $0x68] sm:$0xff]  ;;  %v54_v23 = vpack.c.bf16 %v44_v20, %v43_v19  ;;  %v47_v25 = vld [vmem:[%s1206_s0 + $0x70] sm:$0xff] }
   0x7   :  { %863 = vmatprep.mubr.msk.bf16.mxu0 %vm65_vm1, %v51_v10  ;;  %876 = vmatpush3.bf16.msra.mxu1 %v948_v15  ;;  %v55_v24 = vpack.c.bf16 %v46_v22, %v45_v21  ;;  %v48_v26 = vld [vmem:[%s1206_s0 + $0x78] sm:$0xff]  ;;  %v950_v28 = vld [vmem:[%s1207_s3 + $0x10] sm:$0xff]   ;;  %v952_v30 = vld [vmem:[%s1208_s5] sm:$0xff]  }
   0x8   :  { %877 = vmatprep.subr.bf16.mxu1 %v949_v16  ;;  %v56_v27 = vpack.c.bf16 %v48_v26, %v47_v25  ;;  %v951_v29 = vld [vmem:[%s1207_s3 + $0x18] sm:$0xff]   ;;  %v953_v31 = vld [vmem:[%s1208_s5 + $0x8] sm:$0xff]   ;;  %899 = vmatprep.subr.bf16.mxu0 %v952_v30  ;;  %v954_v32 = vld [vmem:[%s1208_s5 + $0x10] sm:$0xff]  }
   0x9   :  { %900 = vmatpush3.bf16.msra.mxu0 %v952_v30  ;;  %v764_v33 = vld [vmem:[%s1209_s2] ss:$0 sm:$0xff]  ;;  %v955_v26 = vld [vmem:[%s1208_s5 + $0x18] sm:$0xff]  }
   0xa   :  { %901 = vmatprep.subr.bf16.mxu0 %v953_v31  ;;  %v773_v30 = vld [vmem:[%s1211_s4] ss:$0 sm:$0xff] }
   0xb   :  { %878 = vmatpush3.bf16.msra.mxu1 %v949_v16 }
   0xc   :  { %879 = vmatprep.subr.bf16.mxu1 %v950_v28 }
   0xd   :  { %902 = vmatpush3.bf16.msra.mxu0 %v953_v31 }
   0xe   :  { %864 = vmatmul.mubr.msk.bf16.gmra.mrb[4].mxu0 %vm65_vm1, %v52_v17  ;;  %903 = vmatprep.subr.bf16.mxu0 %v954_v32 }
   0xf   :  { %867 = vmatprep.mubr.msk.bf16.mxu0 %vm65_vm1, %v53_v18  ;;  %880 = vmatpush3.bf16.msra.mxu1 %v950_v28  ;;  %v957_v28 = vld [vmem:[%s1210_s7 + $0x8] sm:$0xff]  }
  0x10   :  { %881 = vmatprep.subr.bf16.mxu1 %v951_v29 }
  0x11   :  { %904 = vmatpush3.bf16.msra.mxu0 %v954_v32 }
  0x12   :  { %905 = vmatprep.subr.bf16.mxu0 %v955_v26 }
  0x13   :  { %882 = vmatpush3.bf16.msra.mxu1 %v951_v29  ;;  %v958_v29 = vld [vmem:[%s1210_s7 + $0x10] sm:$0xff]  }
  0x15   :  { %906 = vmatpush3.bf16.msra.mxu0 %v955_v26 }
  0x16   :  { %868 = vmatmul.mubr.msk.bf16.gmra.mrb[8].mxu0 %vm65_vm1, %v54_v23 }
  0x17   :  { %871 = vmatprep.mubr.msk.bf16.mxu0 %vm65_vm1, %v55_v24 }
  0x1e   :  { %872 = vmatmul.mubr.msk.bf16.gmra.mrb[12].mxu0 %vm65_vm1, %v56_v27  ;;  %v956_v27 = vld [vmem:[%s1210_s7] sm:$0xff]  }
  0x1f   :  { %923 = vmatprep.subr.bf16.mxu1 %v956_v27 }
  0xd9   :  { %v861_v34 = vpop.f32.mrb[0].mxu0 }
  0xda   :  { %v137_v35 = vadd.f32 %v861_v34, %v764_v33  ;;  %v128_v36 = vpop.f32.mrb[1].mxu0 }
  0xdb   :  { %v129_v37 = vadd.f32 %v764_v33, %v128_v36  ;;  %v862_v38 = vpop.f32.mrb[2].mxu0 }
  0xdc   :  { %v140_v39 = vadd.f32 %v862_v38, %v764_v33  ;;  %v131_v40 = vpop.f32.mrb[3].mxu0  ;;  %v193_v42 = vmax.f32 %v137_v35, 0.0 }
  0xdd   :  { %v132_v41 = vadd.f32 %v764_v33, %v131_v40  ;;  %v191_v44 = vmax.f32 %v129_v37, 0.0 }
  0xde   :  { %v194_v43 = vmax.f32 %v140_v39, 0.0 }
  0xdf   :  { %v192_v45 = vmax.f32 %v132_v41, 0.0 }
  0xe0   :  { %v208_v46 = vpack.c.bf16 %v194_v43, %v193_v42 }
  0xe1   :  { %v865_v47 = vpop.f32.mrb[4].mxu0  ;;  %v207_v48 = vpack.c.bf16 %v192_v45, %v191_v44 }
  0xe2   :  { %v153_v49 = vadd.f32 %v865_v47, %v764_v33  ;;  %v144_v50 = vpop.f32.mrb[5].mxu0 }
  0xe3   :  { %v145_v51 = vadd.f32 %v764_v33, %v144_v50  ;;  %v866_v52 = vpop.f32.mrb[6].mxu0  ;;  %883 = vmatprep.mubr.msk.bf16.mxu1 %vm254_vm2, %v207_v48 }
  0xe4   :  { %v156_v53 = vadd.f32 %v866_v52, %v764_v33  ;;  %v147_v54 = vpop.f32.mrb[7].mxu0  ;;  %884 = vmatmul.mubr.msk.bf16.vlgmr.msra.gmra.mrb[0].mxu1 %vm254_vm2, %v208_v46  ;;  %v197_v56 = vmax.f32 %v153_v49, 0.0 }
  0xe5   :  { %v148_v55 = vadd.f32 %v764_v33, %v147_v54  ;;  %v195_v58 = vmax.f32 %v145_v51, 0.0  ;;  %924 = vmatpush3.bf16.msra.mxu1 %v956_v27 }
  0xe6   :  { %v198_v57 = vmax.f32 %v156_v53, 0.0  ;;  %925 = vmatprep.subr.bf16.mxu1 %v957_v28 }
  0xe7   :  { %v196_v59 = vmax.f32 %v148_v55, 0.0 }
  0xe8   :  { %v210_v60 = vpack.c.bf16 %v198_v57, %v197_v56 }
  0xe9   :  { %v209_v61 = vpack.c.bf16 %v196_v59, %v195_v58  ;;  %v869_v62 = vpop.f32.mrb[8].mxu0  ;;  %926 = vmatpush3.bf16.msra.mxu1 %v957_v28 }
  0xea   :  { %v169_v63 = vadd.f32 %v869_v62, %v764_v33  ;;  %v160_v0 = vpop.f32.mrb[9].mxu0  ;;  %927 = vmatprep.subr.bf16.mxu1 %v958_v29 }
  0xeb   :  { %v161_v1 = vadd.f32 %v764_v33, %v160_v0  ;;  %v870_v2 = vpop.f32.mrb[10].mxu0  ;;  %887 = vmatprep.mubr.msk.bf16.mxu1 %vm254_vm2, %v209_v61 }
  0xec   :  { %v172_v3 = vadd.f32 %v870_v2, %v764_v33  ;;  %v163_v4 = vpop.f32.mrb[11].mxu0  ;;  %888 = vmatmul.mubr.msk.bf16.gmra.mrb[4].mxu1 %vm254_vm2, %v210_v60  ;;  %v201_v6 = vmax.f32 %v169_v63, 0.0 }
  0xed   :  { %v164_v5 = vadd.f32 %v764_v33, %v163_v4  ;;  %v199_v8 = vmax.f32 %v161_v1, 0.0  ;;  %928 = vmatpush3.bf16.msra.mxu1 %v958_v29 }
  0xee   :  { %v202_v7 = vmax.f32 %v172_v3, 0.0 }
  0xef   :  { %v200_v9 = vmax.f32 %v164_v5, 0.0 }
  0xf0   :  { %v212_v10 = vpack.c.bf16 %v202_v7, %v201_v6 }
  0xf1   :  { %v211_v11 = vpack.c.bf16 %v200_v9, %v199_v8  ;;  %v873_v12 = vpop.f32.mrb[12].mxu0 }
  0xf2   :  { %v185_v13 = vadd.f32 %v873_v12, %v764_v33  ;;  %v176_v14 = vpop.f32.mrb[13].mxu0 }
  0xf3   :  { %v177_v15 = vadd.f32 %v764_v33, %v176_v14  ;;  %v874_v16 = vpop.f32.mrb[14].mxu0  ;;  %891 = vmatprep.mubr.msk.bf16.mxu1 %vm254_vm2, %v211_v11 }
  0xf4   :  { %v188_v17 = vadd.f32 %v874_v16, %v764_v33  ;;  %v179_v18 = vpop.f32.mrb[15].mxu0  ;;  %892 = vmatmul.mubr.msk.bf16.gmra.mrb[8].mxu1 %vm254_vm2, %v212_v10  ;;  %v205_v20 = vmax.f32 %v185_v13, 0.0 }
  0xf5   :  { %v180_v19 = vadd.f32 %v764_v33, %v179_v18  ;;  %v203_v22 = vmax.f32 %v177_v15, 0.0 }
  0xf6   :  { %v206_v21 = vmax.f32 %v188_v17, 0.0 }
  0xf7   :  { %v204_v23 = vmax.f32 %v180_v19, 0.0 }
  0xf8   :  { %v214_v24 = vpack.c.bf16 %v206_v21, %v205_v20 }
  0xf9   :  { %v213_v25 = vpack.c.bf16 %v204_v23, %v203_v22  ;;  %v959_v23 = vld [vmem:[%s1210_s7 + $0x18] sm:$0xff]  }
  0xfa   :  { %929 = vmatprep.subr.bf16.mxu1 %v959_v23 }
  0xfb   :  { %895 = vmatprep.mubr.msk.bf16.mxu1 %vm254_vm2, %v213_v25  ;;  %930 = vmatpush3.bf16.msra.mxu1 %v959_v23 }
  0xfc   :  { %896 = vmatmul.mubr.msk.bf16.gmra.mrb[12].mxu1 %vm254_vm2, %v214_v24  ;;  %v786_v24 = vld [vmem:[%s1212_s6] ss:$0 sm:$0xff] }
 0x1b7   :  { %v885_v31 = vpop.f32.mrb[0].mxu1 }
 0x1b8   :  { %v322_v32 = vadd.f32 %v885_v31, %v773_v30  ;;  %v313_v33 = vpop.f32.mrb[1].mxu1 }
 0x1b9   :  { %v314_v34 = vadd.f32 %v773_v30, %v313_v33  ;;  %v886_v35 = vpop.f32.mrb[2].mxu1 }
 0x1ba   :  { %v325_v36 = vadd.f32 %v886_v35, %v773_v30  ;;  %v316_v37 = vpop.f32.mrb[3].mxu1  ;;  %v378_v39 = vmax.f32 %v322_v32, 0.0 }
 0x1bb   :  { %v317_v38 = vadd.f32 %v773_v30, %v316_v37  ;;  %v376_v41 = vmax.f32 %v314_v34, 0.0 }
 0x1bc   :  { %v379_v40 = vmax.f32 %v325_v36, 0.0 }
 0x1bd   :  { %v377_v42 = vmax.f32 %v317_v38, 0.0 }
 0x1be   :  { %v393_v43 = vpack.c.bf16 %v379_v40, %v378_v39 }
 0x1bf   :  { %v392_v44 = vpack.c.bf16 %v377_v42, %v376_v41  ;;  %v889_v45 = vpop.f32.mrb[4].mxu1 }
 0x1c0   :  { %v338_v46 = vadd.f32 %v889_v45, %v773_v30  ;;  %v329_v47 = vpop.f32.mrb[5].mxu1 }
 0x1c1   :  { %v330_v48 = vadd.f32 %v773_v30, %v329_v47  ;;  %v890_v49 = vpop.f32.mrb[6].mxu1  ;;  %907 = vmatprep.mubr.msk.bf16.mxu0 %vm254_vm2, %v392_v44 }
 0x1c2   :  { %v341_v50 = vadd.f32 %v890_v49, %v773_v30  ;;  %v332_v51 = vpop.f32.mrb[7].mxu1  ;;  %908 = vmatmul.mubr.msk.bf16.vlgmr.msra.gmra.mrb[16].mxu0 %vm254_vm2, %v393_v43  ;;  %v382_v53 = vmax.f32 %v338_v46, 0.0 }
 0x1c3   :  { %v333_v52 = vadd.f32 %v773_v30, %v332_v51  ;;  %v380_v55 = vmax.f32 %v330_v48, 0.0 }
 0x1c4   :  { %v383_v54 = vmax.f32 %v341_v50, 0.0 }
 0x1c5   :  { %v381_v56 = vmax.f32 %v333_v52, 0.0 }
 0x1c6   :  { %v395_v57 = vpack.c.bf16 %v383_v54, %v382_v53 }
 0x1c7   :  { %v394_v58 = vpack.c.bf16 %v381_v56, %v380_v55  ;;  %v893_v59 = vpop.f32.mrb[8].mxu1 }
 0x1c8   :  { %v354_v60 = vadd.f32 %v893_v59, %v773_v30  ;;  %v345_v61 = vpop.f32.mrb[9].mxu1 }
 0x1c9   :  { %v346_v62 = vadd.f32 %v773_v30, %v345_v61  ;;  %v894_v63 = vpop.f32.mrb[10].mxu1  ;;  %911 = vmatprep.mubr.msk.bf16.mxu0 %vm254_vm2, %v394_v58 }
 0x1ca   :  { %v357_v0 = vadd.f32 %v894_v63, %v773_v30  ;;  %v348_v1 = vpop.f32.mrb[11].mxu1  ;;  %912 = vmatmul.mubr.msk.bf16.gmra.mrb[20].mxu0 %vm254_vm2, %v395_v57  ;;  %v386_v3 = vmax.f32 %v354_v60, 0.0 }
 0x1cb   :  { %v349_v2 = vadd.f32 %v773_v30, %v348_v1  ;;  %v384_v5 = vmax.f32 %v346_v62, 0.0 }
 0x1cc   :  { %v387_v4 = vmax.f32 %v357_v0, 0.0 }
 0x1cd   :  { %v385_v6 = vmax.f32 %v349_v2, 0.0 }
 0x1ce   :  { %v397_v7 = vpack.c.bf16 %v387_v4, %v386_v3 }
 0x1cf   :  { %v396_v8 = vpack.c.bf16 %v385_v6, %v384_v5  ;;  %v897_v9 = vpop.f32.mrb[12].mxu1 }
 0x1d0   :  { %v370_v10 = vadd.f32 %v897_v9, %v773_v30  ;;  %v361_v11 = vpop.f32.mrb[13].mxu1 }
 0x1d1   :  { %v362_v12 = vadd.f32 %v773_v30, %v361_v11  ;;  %v898_v13 = vpop.f32.mrb[14].mxu1  ;;  %915 = vmatprep.mubr.msk.bf16.mxu0 %vm254_vm2, %v396_v8 }
 0x1d2   :  { %v373_v14 = vadd.f32 %v898_v13, %v773_v30  ;;  %v364_v15 = vpop.f32.mrb[15].mxu1  ;;  %916 = vmatmul.mubr.msk.bf16.gmra.mrb[24].mxu0 %vm254_vm2, %v397_v7  ;;  %v390_v17 = vmax.f32 %v370_v10, 0.0 }
 0x1d3   :  { %v365_v16 = vadd.f32 %v773_v30, %v364_v15  ;;  %v388_v19 = vmax.f32 %v362_v12, 0.0 }
 0x1d4   :  { %v391_v18 = vmax.f32 %v373_v14, 0.0 }
 0x1d5   :  { %v389_v20 = vmax.f32 %v365_v16, 0.0 }
 0x1d6   :  { %v399_v21 = vpack.c.bf16 %v391_v18, %v390_v17  ;;  %v799_v17 = vld [vmem:[%s1213_s8] ss:$0 sm:$0xff] }
 0x1d7   :  { %v398_v22 = vpack.c.bf16 %v389_v20, %v388_v19 }
 0x1d9   :  { %919 = vmatprep.mubr.msk.bf16.mxu0 %vm254_vm2, %v398_v22 }
 0x1da   :  { %920 = vmatmul.mubr.msk.bf16.gmra.mrb[28].mxu0 %vm254_vm2, %v399_v21 }
 0x295   :  { %v909_v25 = vpop.f32.mrb[16].mxu0 }
 0x296   :  { %v506_v26 = vadd.f32 %v909_v25, %v786_v24  ;;  %v497_v27 = vpop.f32.mrb[17].mxu0 }
 0x297   :  { %v498_v28 = vadd.f32 %v786_v24, %v497_v27  ;;  %v910_v29 = vpop.f32.mrb[18].mxu0 }
 0x298   :  { %v509_v30 = vadd.f32 %v910_v29, %v786_v24  ;;  %v500_v31 = vpop.f32.mrb[19].mxu0  ;;  %v562_v33 = vmax.f32 %v506_v26, 0.0 }
 0x299   :  { %v501_v32 = vadd.f32 %v786_v24, %v500_v31  ;;  %v560_v35 = vmax.f32 %v498_v28, 0.0 }
 0x29a   :  { %v563_v34 = vmax.f32 %v509_v30, 0.0 }
 0x29b   :  { %v561_v36 = vmax.f32 %v501_v32, 0.0 }
 0x29c   :  { %v577_v37 = vpack.c.bf16 %v563_v34, %v562_v33 }
 0x29d   :  { %v576_v38 = vpack.c.bf16 %v561_v36, %v560_v35  ;;  %v913_v39 = vpop.f32.mrb[20].mxu0 }
 0x29e   :  { %v522_v40 = vadd.f32 %v913_v39, %v786_v24  ;;  %v513_v41 = vpop.f32.mrb[21].mxu0 }
 0x29f   :  { %v514_v42 = vadd.f32 %v786_v24, %v513_v41  ;;  %v914_v43 = vpop.f32.mrb[22].mxu0  ;;  %931 = vmatprep.mubr.msk.bf16.mxu1 %vm254_vm2, %v576_v38 }
 0x2a0   :  { %v525_v44 = vadd.f32 %v914_v43, %v786_v24  ;;  %v516_v45 = vpop.f32.mrb[23].mxu0  ;;  %932 = vmatmul.mubr.msk.bf16.vlgmr.msra.gmra.mrb[16].mxu1 %vm254_vm2, %v577_v37  ;;  %v566_v47 = vmax.f32 %v522_v40, 0.0 }
 0x2a1   :  { %v517_v46 = vadd.f32 %v786_v24, %v516_v45  ;;  %v564_v49 = vmax.f32 %v514_v42, 0.0 }
 0x2a2   :  { %v567_v48 = vmax.f32 %v525_v44, 0.0 }
 0x2a3   :  { %v565_v50 = vmax.f32 %v517_v46, 0.0 }
 0x2a4   :  { %v579_v51 = vpack.c.bf16 %v567_v48, %v566_v47 }
 0x2a5   :  { %v578_v52 = vpack.c.bf16 %v565_v50, %v564_v49  ;;  %v917_v53 = vpop.f32.mrb[24].mxu0 }
 0x2a6   :  { %v538_v54 = vadd.f32 %v917_v53, %v786_v24  ;;  %v529_v55 = vpop.f32.mrb[25].mxu0 }
 0x2a7   :  { %v530_v56 = vadd.f32 %v786_v24, %v529_v55  ;;  %v918_v57 = vpop.f32.mrb[26].mxu0  ;;  %935 = vmatprep.mubr.msk.bf16.mxu1 %vm254_vm2, %v578_v52 }
 0x2a8   :  { %v541_v58 = vadd.f32 %v918_v57, %v786_v24  ;;  %v532_v59 = vpop.f32.mrb[27].mxu0  ;;  %936 = vmatmul.mubr.msk.bf16.gmra.mrb[20].mxu1 %vm254_vm2, %v579_v51  ;;  %v570_v61 = vmax.f32 %v538_v54, 0.0 }
 0x2a9   :  { %v533_v60 = vadd.f32 %v786_v24, %v532_v59  ;;  %v568_v63 = vmax.f32 %v530_v56, 0.0 }
 0x2aa   :  { %v571_v62 = vmax.f32 %v541_v58, 0.0 }
 0x2ab   :  { %v569_v0 = vmax.f32 %v533_v60, 0.0 }
 0x2ac   :  { %v581_v1 = vpack.c.bf16 %v571_v62, %v570_v61 }
 0x2ad   :  { %v580_v2 = vpack.c.bf16 %v569_v0, %v568_v63  ;;  %v921_v3 = vpop.f32.mrb[28].mxu0 }
 0x2ae   :  { %v554_v4 = vadd.f32 %v921_v3, %v786_v24  ;;  %v545_v5 = vpop.f32.mrb[29].mxu0 }
 0x2af   :  { %v546_v6 = vadd.f32 %v786_v24, %v545_v5  ;;  %v922_v7 = vpop.f32.mrb[30].mxu0  ;;  %939 = vmatprep.mubr.msk.bf16.mxu1 %vm254_vm2, %v580_v2 }
 0x2b0   :  { %v557_v8 = vadd.f32 %v922_v7, %v786_v24  ;;  %v548_v9 = vpop.f32.mrb[31].mxu0  ;;  %940 = vmatmul.mubr.msk.bf16.gmra.mrb[24].mxu1 %vm254_vm2, %v581_v1  ;;  %v574_v11 = vmax.f32 %v554_v4, 0.0 }
 0x2b1   :  { %v549_v10 = vadd.f32 %v786_v24, %v548_v9  ;;  %v572_v13 = vmax.f32 %v546_v6, 0.0 }
 0x2b2   :  { %v575_v12 = vmax.f32 %v557_v8, 0.0 }
 0x2b3   :  { %v573_v14 = vmax.f32 %v549_v10, 0.0 }
 0x2b4   :  { %v583_v15 = vpack.c.bf16 %v575_v12, %v574_v11 }
 0x2b5   :  { %v582_v16 = vpack.c.bf16 %v573_v14, %v572_v13 }
 0x2b7   :  { %943 = vmatprep.mubr.msk.bf16.mxu1 %vm254_vm2, %v582_v16 }
 0x2b8   :  { %944 = vmatmul.mubr.msk.bf16.gmra.mrb[28].mxu1 %vm254_vm2, %v583_v15 }
 0x373   :  { %v933_v18 = vpop.f32.mrb[16].mxu1 }
 0x374   :  { %v690_v19 = vadd.f32 %v933_v18, %v799_v17  ;;  %v681_v20 = vpop.f32.mrb[17].mxu1 }
 0x375   :  { %v682_v21 = vadd.f32 %v799_v17, %v681_v20  ;;  %v934_v22 = vpop.f32.mrb[18].mxu1 }
 0x376   :  { %746 = vst.msk [vmem:[%s1214_s9 + $0x10] sm:$0xff] %vm65_vm1, %v690_v19  ;;  %v693_v23 = vadd.f32 %v934_v22, %v799_v17  ;;  %v684_v24 = vpop.f32.mrb[19].mxu1 }
 0x377   :  { %744 = vst.msk [vmem:[%s1214_s9] sm:$0xff] %vm65_vm1, %v682_v21  ;;  %v685_v25 = vadd.f32 %v799_v17, %v684_v24 }
 0x378   :  { %747 = vst.msk [vmem:[%s1214_s9 + $0x18] sm:$0xff] %vm65_vm1, %v693_v23 }
 0x379   :  { %745 = vst.msk [vmem:[%s1214_s9 + $0x8] sm:$0xff] %vm65_vm1, %v685_v25 }
 0x37b   :  { %v937_v26 = vpop.f32.mrb[20].mxu1 }
 0x37c   :  { %v706_v27 = vadd.f32 %v937_v26, %v799_v17  ;;  %v697_v28 = vpop.f32.mrb[21].mxu1 }
 0x37d   :  { %v698_v29 = vadd.f32 %v799_v17, %v697_v28  ;;  %v938_v30 = vpop.f32.mrb[22].mxu1 }
 0x37e   :  { %750 = vst.msk [vmem:[%s1214_s9 + $0x30] sm:$0xff] %vm65_vm1, %v706_v27  ;;  %v709_v31 = vadd.f32 %v938_v30, %v799_v17  ;;  %v700_v32 = vpop.f32.mrb[23].mxu1 }
 0x37f   :  { %748 = vst.msk [vmem:[%s1214_s9 + $0x20] sm:$0xff] %vm65_vm1, %v698_v29  ;;  %v701_v33 = vadd.f32 %v799_v17, %v700_v32 }
 0x380   :  { %751 = vst.msk [vmem:[%s1214_s9 + $0x38] sm:$0xff] %vm65_vm1, %v709_v31 }
 0x381   :  { %749 = vst.msk [vmem:[%s1214_s9 + $0x28] sm:$0xff] %vm65_vm1, %v701_v33 }
 0x383   :  { %v941_v34 = vpop.f32.mrb[24].mxu1 }
 0x384   :  { %v722_v35 = vadd.f32 %v941_v34, %v799_v17  ;;  %v713_v36 = vpop.f32.mrb[25].mxu1 }
 0x385   :  { %v714_v37 = vadd.f32 %v799_v17, %v713_v36  ;;  %v942_v38 = vpop.f32.mrb[26].mxu1 }
 0x386   :  { %754 = vst.msk [vmem:[%s1214_s9 + $0x50] sm:$0xff] %vm65_vm1, %v722_v35  ;;  %v725_v39 = vadd.f32 %v942_v38, %v799_v17  ;;  %v716_v40 = vpop.f32.mrb[27].mxu1 }
 0x387   :  { %752 = vst.msk [vmem:[%s1214_s9 + $0x40] sm:$0xff] %vm65_vm1, %v714_v37  ;;  %v717_v41 = vadd.f32 %v799_v17, %v716_v40 }
 0x388   :  { %755 = vst.msk [vmem:[%s1214_s9 + $0x58] sm:$0xff] %vm65_vm1, %v725_v39 }
 0x389   :  { %753 = vst.msk [vmem:[%s1214_s9 + $0x48] sm:$0xff] %vm65_vm1, %v717_v41 }
 0x38b   :  { %v945_v42 = vpop.f32.mrb[28].mxu1 }
 0x38c   :  { %v738_v43 = vadd.f32 %v945_v42, %v799_v17  ;;  %v729_v44 = vpop.f32.mrb[29].mxu1 }
 0x38d   :  { %v730_v45 = vadd.f32 %v799_v17, %v729_v44  ;;  %v946_v46 = vpop.f32.mrb[30].mxu1 }
 0x38e   :  { %758 = vst.msk [vmem:[%s1214_s9 + $0x70] sm:$0xff] %vm65_vm1, %v738_v43  ;;  %v741_v47 = vadd.f32 %v946_v46, %v799_v17  ;;  %v732_v48 = vpop.f32.mrb[31].mxu1 }
 0x38f   :  { %756 = vst.msk [vmem:[%s1214_s9 + $0x60] sm:$0xff] %vm65_vm1, %v730_v45  ;;  %v733_v49 = vadd.f32 %v799_v17, %v732_v48 }
 0x390   :  { %759 = vst.msk [vmem:[%s1214_s9 + $0x78] sm:$0xff] %vm65_vm1, %v741_v47 }
 0x391   :  { %757 = vst.msk [vmem:[%s1214_s9 + $0x68] sm:$0xff] %vm65_vm1, %v733_v49 }

</bundles_post_ra>
